<compile_context>
chip_gen: v6e
topology: v6e:2x2x1
jax: 0.10.0
libtpu: 0.0.40
codegen_flags: <defaults>
</compile_context>

<pallas_src>
import math
import functools

import jax
import jax.numpy as jnp
from jax.experimental import pallas as pl
from jax.experimental.pallas import tpu as pltpu


def _fused_rnn_kernel(xk_ref, w_ref, o_ref, *, nonlinearity):
    # xk_ref : (tile_b, K)       K = input_size (+ hidden_size if h given)
    # w_ref  : (K, tile_n)       stacked [W_ih; W_hh], columns padded to 128s
    # o_ref  : (tile_b, tile_n)
    acc = jnp.dot(xk_ref[...], w_ref[...], preferred_element_type=jnp.float32)
    if nonlinearity == "tanh":
        acc = jnp.tanh(acc)            # EUP transcendental (separate slot)
    else:                              # 'relu'
        acc = jnp.maximum(acc, 0.0)    # VPU
    o_ref[...] = acc.astype(o_ref.dtype)


def _vmem_budget_bytes():
    """Per-chip VMEM budget with ~25% headroom for compiler scratch."""
    try:
        cap = pltpu.get_tpu_info().vmem_capacity_bytes
        return int(cap * 3 // 4)           # 96 MiB on v5e/v6e, 48 MiB on v7x
    except Exception:
        return 48 * 1024 * 1024            # safe everywhere


def my_rnn_layer_forward(my_input, weight_ih, weight_hh, hidden=None,
                         nonlinearity="tanh", tile_b=512, tile_n=512,
                         use_bf16_matmul=False):
    """my_input: (B, input_size); weight_ih: (input_size, H); weight_hh: (H, H).

    Returns next_hidden: (B, H), matching MyRNNLayer.forward.
    """
    if nonlinearity not in ("tanh", "relu"):
        raise ValueError(f"unsupported nonlinearity: {nonlinearity}")

    B, _ = my_input.shape
    H = weight_ih.shape[1]
    out_dtype = my_input.dtype

    # --- Fuse the two matmuls; statically skip W_hh when hidden is None. ---
    if hidden is None:
        xk = my_input
        w = weight_ih
    else:
        xk = jnp.concatenate([my_input, hidden], axis=1)        # (B, K)
        w = jnp.concatenate([weight_ih, weight_hh], axis=0)     # (K, H)
    K = xk.shape[1]

    # --- Lane-dense N: pad hidden columns up to a multiple of 128. ---
    H_pad = ((H + 127) // 128) * 128
    if H_pad != H:
        w = jnp.pad(w, ((0, 0), (0, H_pad - H)))

    # --- Optional bf16 operand path (accumulation/activation stay f32). ---
    if use_bf16_matmul:
        xk = xk.astype(jnp.bfloat16)
        w = w.astype(jnp.bfloat16)

    # --- Tile sizing. ---
    tile_n = max(128, min(H_pad, ((int(tile_n) + 127) // 128) * 128))
    if B <= tile_b:
        tile_b = B                          # block == full dim: always legal
    else:
        tile_b = max(8, (int(tile_b) // 8) * 8)

    budget = _vmem_budget_bytes()
    soft = int(budget * 0.8)
    in_item = jnp.dtype(xk.dtype).itemsize
    out_item = jnp.dtype(out_dtype).itemsize

    def _footprint(tb, tn):
        stream = 2 * (tb * K * in_item + tb * tn * out_item)   # dbl-buffered
        wts = 2 * (K * tn * in_item)                           # weight tile
        return stream + wts

    while _footprint(tile_b, tile_n) > soft and tile_b > 8 and tile_b % 8 == 0:
        tile_b = max(8, (tile_b // 2) // 8 * 8)
    while _footprint(tile_b, tile_n) > soft and tile_n > 128:
        tile_n = max(128, (tile_n // 2) // 128 * 128)

    grid = (pl.cdiv(B, tile_b), pl.cdiv(H_pad, tile_n))

    kernel = functools.partial(_fused_rnn_kernel, nonlinearity=nonlinearity)

    out = pl.pallas_call(
        kernel,
        out_shape=jax.ShapeDtypeStruct((B, H_pad), out_dtype),
        grid_spec=pltpu.PrefetchScalarGridSpec(
            num_scalar_prefetch=0,
            grid=grid,
            in_specs=[
                # Activations: row-tiled, constant over the N axis (Pallas
                # skips the re-DMA when the block index is unchanged).
                pl.BlockSpec((tile_b, K), lambda i, j: (i, 0)),
                # Stacked weights: column (N) tiled.
                pl.BlockSpec((K, tile_n), lambda i, j: (0, j)),
            ],
            out_specs=pl.BlockSpec((tile_b, tile_n), lambda i, j: (i, j)),
        ),
        compiler_params=pltpu.CompilerParams(
            dimension_semantics=("parallel", "parallel"),
            vmem_limit_bytes=budget,
        ),
    )(xk, w)

    return out[:, :H] if H_pad != H else out


def init_params(input_size, hidden_size, key):
    """Matches MyRNNLayer.reset_parameters: uniform(+-sqrt(1/hidden_size))."""
    k1, k2 = jax.random.split(key)
    bound = math.sqrt(1.0 / hidden_size)
    weight_ih = jax.random.uniform(k1, (input_size, hidden_size), jnp.float32,
                                   minval=-bound, maxval=bound)
    weight_hh = jax.random.uniform(k2, (hidden_size, hidden_size), jnp.float32,
                                   minval=-bound, maxval=bound)
    return weight_ih, weight_hh


if __name__ == "__main__":
    # Small shapes consistent with the module: hidden_size=64 (file constant),
    # input_size=32, batch=8.
    input_size, hidden_size = 32, 64
    B = 8

    key = jax.random.PRNGKey(0)
    k_x, k_h, k_p = jax.random.split(key, 3)

    x = jax.random.normal(k_x, (B, input_size), jnp.float32)
    h0 = jax.random.normal(k_h, (B, hidden_size), jnp.float32)
    weight_ih, weight_hh = init_params(input_size, hidden_size, k_p)

    # Case 1: hidden=None (module default: zeros), tanh. W_hh statically skipped.
    out_none = my_rnn_layer_forward(x, weight_ih, weight_hh, hidden=None,
                                    nonlinearity="tanh")
    out_none = jax.block_until_ready(out_none)
    ref_none = jnp.tanh(x @ weight_ih)
    assert out_none.shape == (B, hidden_size)
    assert jnp.allclose(out_none, ref_none, atol=1e-5, rtol=1e-5)

    # Case 2: explicit hidden state, tanh nonlinearity (fused single matmul).
    out_h = my_rnn_layer_forward(x, weight_ih, weight_hh, hidden=h0,
                                 nonlinearity="tanh")
    out_h = jax.block_until_ready(out_h)
    ref_h = jnp.tanh(x @ weight_ih + h0 @ weight_hh)
    assert out_h.shape == (B, hidden_size)
    assert jnp.allclose(out_h, ref_h, atol=1e-5, rtol=1e-5)

    # Case 3: relu branch.
    out_relu = my_rnn_layer_forward(x, weight_ih, weight_hh, hidden=h0,
                                    nonlinearity="relu")
    out_relu = jax.block_until_ready(out_relu)
    ref_relu = jnp.maximum(x @ weight_ih + h0 @ weight_hh, 0.0)
    assert jnp.allclose(out_relu, ref_relu, atol=1e-5, rtol=1e-5)

    # Case 4: bf16 operand path (f32 accumulation/activation), looser tolerance.
    out_bf16 = my_rnn_layer_forward(x, weight_ih, weight_hh, hidden=h0,
                                    nonlinearity="tanh", use_bf16_matmul=True)
    out_bf16 = jax.block_until_ready(out_bf16)
    assert out_bf16.dtype == x.dtype
    assert jnp.allclose(out_bf16, ref_h, atol=3e-2, rtol=3e-2)

    print("KERNEL_OK")
</pallas_src>

<mosaic_0001>
module attributes {stable_mosaic.version = 11 : i64} {
  func.func @_fused_rnn_kernel(%arg0: i32, %arg1: i32, %arg2: memref<8x32xf32, #tpu.memory_space<vmem>>, %arg3: memref<32x128xf32, #tpu.memory_space<vmem>>, %arg4: memref<8x128xf32, #tpu.memory_space<vmem>>) attributes {dimension_semantics = [#tpu.dimension_semantics<parallel>, #tpu.dimension_semantics<parallel>], iteration_bounds = array<i64: 1, 1>, scalar_prefetch = 0 : i64, scratch_operands = 0 : i64, tpu.core_type = #tpu.core_type<tc>, window_params = [{transform_indices = @transform_0, window_bounds = array<i64: 8, 32>}, {transform_indices = @transform_1, window_bounds = array<i64: 32, 128>}, {transform_indices = @transform_2, window_bounds = array<i64: 8, 128>}]} {
    %c0 = arith.constant 0 : index
    %c0_0 = arith.constant 0 : index
    %0 = vector.load %arg2[%c0, %c0_0] : memref<8x32xf32, #tpu.memory_space<vmem>>, vector<8x32xf32>
    %c0_1 = arith.constant 0 : index
    %c0_2 = arith.constant 0 : index
    %1 = vector.load %arg3[%c0_1, %c0_2] : memref<32x128xf32, #tpu.memory_space<vmem>>, vector<32x128xf32>
    %cst = arith.constant dense<0.000000e+00> : vector<8x128xf32>
    %2 = tpu.matmul %0, %1, %cst {dimension_numbers = #tpu.dot_dimension_numbers<[1], [0], [0], [1], [0, 0, 1, 1], [], []>} : vector<8x32xf32>, vector<32x128xf32>, vector<8x128xf32> -> vector<8x128xf32>
    %3 = math.tanh %2 : vector<8x128xf32>
    %c0_3 = arith.constant 0 : index
    %c0_4 = arith.constant 0 : index
    %4 = vector.load %arg4[%c0_3, %c0_4] : memref<8x128xf32, #tpu.memory_space<vmem>>, vector<8x128xf32>
    tpu.vector_store %arg4[%c0_3, %c0_4], %3 {strides = array<i32>} : memref<8x128xf32, #tpu.memory_space<vmem>>, vector<8x128xf32>,
    return
  }
  func.func @transform_0(%arg0: i32, %arg1: i32) -> (i32, i32) {
    %c0_i32 = arith.constant 0 : i32
    %c0_i32_0 = arith.constant 0 : i32
    return %arg0, %c0_i32 : i32, i32
  }
  func.func @transform_1(%arg0: i32, %arg1: i32) -> (i32, i32) {
    %c0_i32 = arith.constant 0 : i32
    %c0_i32_0 = arith.constant 0 : i32
    return %c0_i32, %arg1 : i32, i32
  }
  func.func @transform_2(%arg0: i32, %arg1: i32) -> (i32, i32) {
    %c0_i32 = arith.constant 0 : i32
    return %arg0, %arg1 : i32, i32
  }
}

</mosaic_0001>

<bundles_post_ra>
// kernel: tpu_custom_call.1
= control target key start
LH: loop header
LB: loop body
LE: loop exit
PB: predicated region body
PF: predicated region fallthrough
CT: control target
= control target key end

     0   :  { %7 = vsyncpa [#allocation3], 0  ;;  %s258_s0 = inlined_call_operand.hbm [shape: f32[8,32], index: 0, kind: input, shape index: {}]   ;;  %s259_s1 = inlined_call_operand.hbm [shape: f32[32,128], index: 1, kind: input, shape index: {}]   ;;  %s260_s2 = inlined_call_operand.hbm [shape: f32[8,128], index: 2, kind: output, shape index: {}]  }
   0x1   :  { %8 = vsyncpa [#allocation6], 0 }
   0x2   :  { %9 = vsyncpa [#allocation4], 0  ;;  %s227_s9 = smov [#allocation2]   ;;  %s228_s11 = smov [#allocation5]  }
   0x3   :  { %s16_s10 = sshll.u32 %s227_s9, 4  ;;  %s25_s12 = sshll.u32 %s228_s11, 4  ;;  %s17_s10 = int_to_ptr.vmem [resolvable:$true] %s16_s10  ;;  %s26_s12 = int_to_ptr.vmem [resolvable:$true] %s25_s12 }
   0x4   :  { %s169_s13 = scalar_lea.vmem %s17_s10, 128  ;;  %p174_p1 = scmp.lt.s32.totalorder %s17_s10, %s17_s10 }
   0x5   :  { %p170_p0 = scmp.ne.s32.totalorder %s17_s10, %s169_s13  ;;  %p175_p2 = scmp.lt.s32.totalorder %s169_s13, %s169_s13 }
   0x7   :  { %p176_p3 = por %p175_p2, %p174_p1 }
   0x9   :  { %p177_p4 = pnand %p176_p3, %p170_p0 }
   0xb   :  { %180 = shalt.err (!%p177_p4)
}
   0xc   :  { %19 = dma.hbm_to_vmem [thread:$0]  %s258_s0, 128, %s17_s10, [#allocation3]  }
   0xd   :  { %s189_s16 = scalar_lea.vmem %s26_s12, 512  ;;  %p194_p6 = scmp.lt.s32.totalorder %s26_s12, %s26_s12 }
   0xe   :  { %p190_p5 = scmp.ne.s32.totalorder %s26_s12, %s189_s16  ;;  %p195_p7 = scmp.lt.s32.totalorder %s189_s16, %s189_s16 }
  0x10   :  { %p196_p8 = por %p195_p7, %p194_p6 }
  0x12   :  { %p197_p9 = pnand %p196_p8, %p190_p5 }
  0x14   :  { %200 = shalt.err (!%p197_p9)
}
  0x15   :  { %s229_s17 = smov 128   ;;  %s230_s18 = smov 8  }
  0x16   :  { %31 = dma.hbm_to_vmem [thread:$0]  %s259_s1, 512, %s26_s12, [#allocation6], %s229_s17, %s229_s17, %s230_s18  }
  0x17   :  { %221 = dma.done.wait [#allocation3], 128  }
  0x18   :  { %222 = vsyncadd [#allocation3], 4294967168 }
  0x19   :  { %223 = dma.done.wait [#allocation6], 512  }
  0x1a   :  { %224 = vsyncadd [#allocation6], 4294966784  ;;  %v231_v0 = vmov 0.0   ;;  %vm232_vm0 = vmmov 0   ;;  %v42_v1 = vld [vmem:[#allocation5 + $0x18] sm:$0xff]  ;;  %v41_v2 = vld [vmem:[#allocation5 + $0x10] sm:$0xff] }
  0x1b   :  { %141 = vmatprep.subr.mxu0 %v231_v0  ;;  %149 = vmatprep.mubr.msk.f32.mxu0 %vm232_vm0, %v231_v0  ;;  %v40_v3 = vld [vmem:[#allocation5 + $0x8] sm:$0xff]  ;;  %v39_v4 = vld [vmem:[#allocation5] sm:$0xff]  ;;  %v38_v5 = vld [vmem:[#allocation2] sm:$0xff]  ;;  %vm43_vm1 = vcmask 261120   ;;  %s233_s0 = smov [#allocation7]  }
  0x1c   :  { %142 = vmatpush3.msra.mxu0 %v42_v1  ;;  %s125_s1 = sshll.u32 %s233_s0, 4  ;;  %s126_s1 = int_to_ptr.vmem [resolvable:$true] %s125_s1 }
  0x1d   :  { %143 = vmatprep.subr.mxu0 %v231_v0  ;;  %s201_s21 = scalar_lea.vmem %s126_s1, 128  ;;  %p206_p11 = scmp.lt.s32.totalorder %s126_s1, %s126_s1 }
  0x1e   :  { %144 = vmatpush3.msra.mxu0 %v41_v2  ;;  %p202_p10 = scmp.ne.s32.totalorder %s126_s1, %s201_s21  ;;  %p207_p12 = scmp.lt.s32.totalorder %s201_s21, %s201_s21 }
  0x1f   :  { %145 = vmatprep.subr.mxu0 %v231_v0 }
  0x20   :  { %146 = vmatpush3.msra.mxu0 %v40_v3  ;;  %p208_p13 = por %p207_p12, %p206_p11 }
  0x21   :  { %147 = vmatprep.subr.mxu0 %v231_v0 }
  0x22   :  { %148 = vmatpush3.msra.mxu0 %v39_v4  ;;  %p209_p0 = pnand %p208_p13, %p202_p10 }
  0x23   :  { %150 = vmatmul.mubr.msk.f32.vlgmr.msra.gmra.mxu0 %vm43_vm1, %v38_v5 }
  0xe3   :  { %v113_v6 = vpop.f32.mrf.mxu0 }
  0xe4   :  { %159 = vtanh.f32 %v113_v6 }
  0xe5   :  { %v151_v7 = vpop.f32.mrf.mxu0 }
  0xf1   :  { %v160_v8 = vpop.eup %159 }
  0xf2   :  { %118 = vst [vmem:[#allocation7] sm:$0xff] %v160_v8 }
  0xf3   :  { %212 = shalt.err (!%p209_p0)
}
  0xf4   :  { %128 = dma.vmem_to_hbm [thread:$0]  %s126_s1, 128, %s260_s2, [#allocation4]  }
  0xf5   :  { %225 = dma.done.wait [#allocation4], 128  }
  0xf6   :  { %226 = vsyncadd [#allocation4], 4294967168 }
  0xf7   :  { %132 = vsyncpa [#allocation3], 1 }
  0xf8   :  { %133 = vsyncpa [#allocation6], 1 }
  0xf9   :  { %134 = vsyncpa [#allocation4], 1 }

</bundles_post_ra>
